<compile_context>
chip_gen: v5e
topology: v5e:2x2
jax: 0.10.0
libtpu: 0.0.40
codegen_flags: <defaults>
</compile_context>

<pallas_src>
import functools
import math

import jax
import jax.numpy as jnp
from jax.experimental import pallas as pl
from jax.experimental.pallas import tpu as pltpu


LANE = 128     # lane width: H and num_labels padded up to multiples of this
SUBLANE = 8    # sublane granularity for the batch tile


def _round_up(x, m):
    return ((x + m - 1) // m) * m


def _device_hints():
    """Best-effort generation detection: (has_two_tensorcores, per-TC VMEM bytes)."""
    kind = ""
    try:
        kind = jax.devices()[0].device_kind.lower()
    except Exception:
        pass
    is_v7x = ("v7" in kind) or ("7x" in kind)
    vmem_cap = (64 if is_v7x else 128) * 1024 * 1024
    return is_v7x, vmem_cap


def _head_kernel(x_ref, w0_ref, b0_ref, w1_ref, b1_ref, w2_ref, b2_ref,
                 logits_ref, pooled_ref):
    """One (block_b, Hp) batch tile: 3 matmuls + biases + tanh, fully VMEM-resident."""
    cdt = w0_ref.dtype                      # MXU compute dtype (bf16)
    x = x_ref[...]
    if x.dtype != cdt:                      # hidden under the MXU; avoids a wrapper pass
        x = x.astype(cdt)

    # dense0 + tanh   (dropout == identity in eval mode)
    h0 = jnp.dot(x, w0_ref[...], preferred_element_type=jnp.float32) + b0_ref[...]
    h0 = jnp.tanh(h0)                       # f32 tanh -> EUP slot, hides under MXU
    # TODO(synk): on v6e/v7x a bf16 tanh (bf16 EUP) would halve the h0/pooled
    # intermediate VMEM traffic; kept f32 for v5e compatibility / accuracy.

    # dense + tanh -> pooled
    p = jnp.dot(h0.astype(cdt), w1_ref[...],
                preferred_element_type=jnp.float32) + b1_ref[...]
    pooled = jnp.tanh(p)

    # out_proj (columns padded lane-dense to a multiple of 128 by prepare_head_params)
    logits = jnp.dot(pooled.astype(cdt), w2_ref[...],
                     preferred_element_type=jnp.float32) + b2_ref[...]

    pooled_ref[...] = pooled.astype(pooled_ref.dtype)
    logits_ref[...] = logits.astype(logits_ref.dtype)


def prepare_head_params(params, *, compute_dtype=jnp.bfloat16):
    """One-time parameter prep (keep OFF the per-call path):
    cast weights to the MXU compute dtype and zero-pad contraction / output dims
    to lane-dense multiples of 128. Biases stay f32 (added post-accumulation)."""
    H = params["w0"].shape[0]
    L = params["w_out"].shape[1]
    Hp = _round_up(H, LANE)
    Lp = _round_up(L, LANE)
    ph, pll = Hp - H, Lp - L
    return {
        "w0": jnp.pad(params["w0"], ((0, ph), (0, ph))).astype(compute_dtype),
        "b0": jnp.pad(params["b0"], ((0, 0), (0, ph))).astype(jnp.float32),
        "w1": jnp.pad(params["w1"], ((0, ph), (0, ph))).astype(compute_dtype),
        "b1": jnp.pad(params["b1"], ((0, 0), (0, ph))).astype(jnp.float32),
        "w2": jnp.pad(params["w_out"], ((0, ph), (0, pll))).astype(compute_dtype),
        "b2": jnp.pad(params["b_out"], ((0, 0), (0, pll))).astype(jnp.float32),
    }


@functools.partial(jax.jit, static_argnames=("num_labels", "block_b", "out_dtype"))
def roberta_classification_head(features, prepped, *, num_labels, block_b=None,
                                out_dtype=None):
    """features: (B, H) in native dtype. prepped: output of prepare_head_params.
    Returns (logits (B, num_labels), pooled (B, H))."""
    if out_dtype is None:
        out_dtype = features.dtype
    B, H = features.shape
    Hp = prepped["w0"].shape[0]
    Lp = prepped["w2"].shape[1]
    L = num_labels
    cdt = prepped["w0"].dtype

    is_v7x, vmem_cap = _device_hints()

    # Batch tiling: multiple of 8 sublanes, cap 512 rows. Only v7x (2 TensorCores)
    # benefits from forcing an even >=2-way split; v5e/v6e get the largest tile.
    B8 = _round_up(B, SUBLANE)
    if block_b is None:
        cap = 512
        if is_v7x and B8 >= 2 * SUBLANE:
            n_tiles = max(2, pl.cdiv(B8, cap))
            n_tiles += n_tiles % 2            # even tile count -> both TCs equally fed
        else:
            n_tiles = max(1, pl.cdiv(B8, cap))
        block_b = _round_up(pl.cdiv(B8, n_tiles), SUBLANE)
    block_b = max(SUBLANE, _round_up(min(block_b, B8), SUBLANE))
    Bp = _round_up(B8, block_b)
    grid = (Bp // block_b,)

    # Pad only when needed; no wrapper-side dtype cast (done in-kernel under the MXU).
    x = features
    if (Bp - B) or (Hp - H):
        x = jnp.pad(x, ((0, Bp - B), (0, Hp - H)))

    # VMEM budget: actual per-step footprint with headroom, capped at 75% of capacity.
    def nbytes(shape, dtype):
        return math.prod(shape) * jnp.dtype(dtype).itemsize

    vmem_need = (
        2 * nbytes((block_b, Hp), x.dtype)                 # x tile (double-buffered)
        + nbytes((Hp, Hp), cdt) * 2                        # w0, w1 (single-buffered)
        + nbytes((Hp, Lp), cdt)                            # w2
        + 2 * nbytes((1, Hp), jnp.float32) + nbytes((1, Lp), jnp.float32)
        + 2 * nbytes((block_b, Lp), out_dtype)             # logits (double-buffered)
        + 2 * nbytes((block_b, Hp), out_dtype)             # pooled (double-buffered)
        + 3 * nbytes((block_b, Hp), jnp.float32)           # f32 h0 / pooled intermediates
        + nbytes((block_b, Lp), jnp.float32)
    )
    vmem_limit = int(min(max(int(1.5 * vmem_need) + (8 << 20), 32 << 20),
                         int(0.75 * vmem_cap)))

    # Constant-index weight/bias blocks: resident across the batch grid, single buffer.
    def resident(shape):
        return pl.BlockSpec(shape, lambda i: (0, 0), pipeline_mode=pl.Buffered(1))

    out_shapes = (
        jax.ShapeDtypeStruct((Bp, Lp), out_dtype),         # padded logits (lane-dense)
        jax.ShapeDtypeStruct((Bp, Hp), out_dtype),         # padded pooled
    )

    logits_p, pooled_p = pl.pallas_call(
        _head_kernel,
        out_shape=out_shapes,
        grid_spec=pltpu.PrefetchScalarGridSpec(
            num_scalar_prefetch=0,
            grid=grid,
            in_specs=[
                pl.BlockSpec((block_b, Hp), lambda i: (i, 0)),   # x tile
                resident((Hp, Hp)),                              # w0 (in,out)
                resident((1, Hp)),                               # b0
                resident((Hp, Hp)),                              # w1 (in,out)
                resident((1, Hp)),                               # b1
                resident((Hp, Lp)),                              # w_out (lane-dense)
                resident((1, Lp)),                               # b_out
            ],
            out_specs=[
                pl.BlockSpec((block_b, Lp), lambda i: (i, 0)),   # logits
                pl.BlockSpec((block_b, Hp), lambda i: (i, 0)),   # pooled
            ],
        ),
        compiler_params=pltpu.CompilerParams(
            dimension_semantics=("parallel",),
            vmem_limit_bytes=vmem_limit,
        ),
    )(x, prepped["w0"], prepped["b0"], prepped["w1"], prepped["b1"],
      prepped["w2"], prepped["b2"])

    return logits_p[:B, :L], pooled_p[:B, :H]


def init_params(key, hidden_size, num_labels, dtype=jnp.float32):
    """Deterministic synthetic parameters matching the PyTorch module's shapes.
    nn.Linear weight is (out, in); we store the transpose (in, out) for the kernel."""
    ks = jax.random.split(key, 6)
    s = 1.0 / jnp.sqrt(hidden_size)
    w0 = jax.random.uniform(ks[0], (hidden_size, hidden_size), dtype, -s, s)
    b0 = jax.random.uniform(ks[1], (1, hidden_size), dtype, -s, s)
    w1 = jax.random.uniform(ks[2], (hidden_size, hidden_size), dtype, -s, s)
    b1 = jax.random.uniform(ks[3], (1, hidden_size), dtype, -s, s)
    w_out = jax.random.uniform(ks[4], (hidden_size, num_labels), dtype, -s, s)
    b_out = jax.random.uniform(ks[5], (1, num_labels), dtype, -s, s)
    # Unused in forward (parity with the PyTorch module's __init__ only):
    ln_gamma = jnp.ones((hidden_size,), dtype)
    ln_beta = jnp.zeros((hidden_size,), dtype)
    return {"w0": w0, "b0": b0, "w1": w1, "b1": b1,
            "w_out": w_out, "b_out": b_out,
            "ln_gamma": ln_gamma, "ln_beta": ln_beta}


def _reference(features, p):
    """Pure-JAX f32 reference of the PyTorch forward (eval mode)."""
    x0 = jnp.tanh(features @ p["w0"] + p["b0"])
    pooled = jnp.tanh(x0 @ p["w1"] + p["b1"])
    logits = pooled @ p["w_out"] + p["b_out"]
    return logits, pooled


if __name__ == "__main__":
    # Small config. BATCH=12 (not a multiple of 8) exercises ragged batch padding;
    # HIDDEN=32 / NUM_LABELS=3 exercise the lane-dense H/L padding + post-slice paths.
    HIDDEN = 32
    NUM_LABELS = 3
    BATCH = 12

    key = jax.random.PRNGKey(0)
    k_x, k_p = jax.random.split(key)

    features = jax.random.normal(k_x, (BATCH, HIDDEN), jnp.float32)
    params = init_params(k_p, HIDDEN, NUM_LABELS)
    prepped = prepare_head_params(params)   # one-time weight cast/pad, off the hot path
    prepped = jax.block_until_ready(prepped)

    # TODO(synk): dropout is identity (eval mode); training-mode dropout would use
    # pltpu.prng_seed / pltpu.stateful_bernoulli in-kernel.

    logits, pooled = roberta_classification_head(features, prepped,
                                                 num_labels=NUM_LABELS)
    logits, pooled = jax.block_until_ready((logits, pooled))

    ref_logits, ref_pooled = _reference(features, params)
    assert logits.shape == (BATCH, NUM_LABELS)
    assert pooled.shape == (BATCH, HIDDEN)
    # bf16 matmul inputs with f32 accumulation -> relaxed tolerance vs f32 reference.
    assert jnp.allclose(logits, ref_logits, atol=3e-2, rtol=3e-2)
    assert jnp.allclose(pooled, ref_pooled, atol=3e-2, rtol=3e-2)

    print("KERNEL_OK")
</pallas_src>

<mosaic_0001>
module attributes {stable_mosaic.version = 11 : i64} {
  func.func @_head_kernel(%arg0: i32, %arg1: memref<16x128xf32, #tpu.memory_space<vmem>>, %arg2: memref<128x128xbf16, #tpu.memory_space<vmem>>, %arg3: memref<1x128xf32, #tpu.memory_space<vmem>>, %arg4: memref<128x128xbf16, #tpu.memory_space<vmem>>, %arg5: memref<1x128xf32, #tpu.memory_space<vmem>>, %arg6: memref<128x128xbf16, #tpu.memory_space<vmem>>, %arg7: memref<1x128xf32, #tpu.memory_space<vmem>>, %arg8: memref<16x128xf32, #tpu.memory_space<vmem>>, %arg9: memref<16x128xf32, #tpu.memory_space<vmem>>) attributes {dimension_semantics = [#tpu.dimension_semantics<parallel>], iteration_bounds = array<i64: 1>, scalar_prefetch = 0 : i64, scratch_operands = 0 : i64, tpu.core_type = #tpu.core_type<tc>, window_params = [{transform_indices = @transform_0, window_bounds = array<i64: 16, 128>}, {pipeline_mode = #tpu.pipeline_mode<synchronous>, transform_indices = @transform_1, window_bounds = array<i64: 128, 128>}, {pipeline_mode = #tpu.pipeline_mode<synchronous>, transform_indices = @transform_2, window_bounds = array<i64: 1, 128>}, {pipeline_mode = #tpu.pipeline_mode<synchronous>, transform_indices = @transform_3, window_bounds = array<i64: 128, 128>}, {pipeline_mode = #tpu.pipeline_mode<synchronous>, transform_indices = @transform_4, window_bounds = array<i64: 1, 128>}, {pipeline_mode = #tpu.pipeline_mode<synchronous>, transform_indices = @transform_5, window_bounds = array<i64: 128, 128>}, {pipeline_mode = #tpu.pipeline_mode<synchronous>, transform_indices = @transform_6, window_bounds = array<i64: 1, 128>}, {transform_indices = @transform_7, window_bounds = array<i64: 16, 128>}, {transform_indices = @transform_8, window_bounds = array<i64: 16, 128>}]} {
    %c0 = arith.constant 0 : index
    %c0_0 = arith.constant 0 : index
    %0 = vector.load %arg1[%c0, %c0_0] : memref<16x128xf32, #tpu.memory_space<vmem>>, vector<16x128xf32>
    %1 = arith.truncf %0 : vector<16x128xf32> to vector<16x128xbf16>
    %c0_1 = arith.constant 0 : index
    %c0_2 = arith.constant 0 : index
    %2 = vector.load %arg2[%c0_1, %c0_2] : memref<128x128xbf16, #tpu.memory_space<vmem>>, vector<128x128xbf16>
    %cst = arith.constant dense<0.000000e+00> : vector<16x128xf32>
    %3 = tpu.matmul %1, %2, %cst {dimension_numbers = #tpu.dot_dimension_numbers<[1], [0], [0], [1], [0, 0, 1, 1], [], []>} : vector<16x128xbf16>, vector<128x128xbf16>, vector<16x128xf32> -> vector<16x128xf32>
    %c0_3 = arith.constant 0 : index
    %c0_4 = arith.constant 0 : index
    %4 = vector.load %arg3[%c0_3, %c0_4] : memref<1x128xf32, #tpu.memory_space<vmem>>, vector<1x128xf32>
    %5 = vector.broadcast %4 : vector<1x128xf32> to vector<16x128xf32>
    %6 = arith.addf %3, %5 : vector<16x128xf32>
    %7 = math.tanh %6 : vector<16x128xf32>
    %8 = arith.truncf %7 : vector<16x128xf32> to vector<16x128xbf16>
    %c0_5 = arith.constant 0 : index
    %c0_6 = arith.constant 0 : index
    %9 = vector.load %arg4[%c0_5, %c0_6] : memref<128x128xbf16, #tpu.memory_space<vmem>>, vector<128x128xbf16>
    %cst_7 = arith.constant dense<0.000000e+00> : vector<16x128xf32>
    %10 = tpu.matmul %8, %9, %cst_7 {dimension_numbers = #tpu.dot_dimension_numbers<[1], [0], [0], [1], [0, 0, 1, 1], [], []>} : vector<16x128xbf16>, vector<128x128xbf16>, vector<16x128xf32> -> vector<16x128xf32>
    %c0_8 = arith.constant 0 : index
    %c0_9 = arith.constant 0 : index
    %11 = vector.load %arg5[%c0_8, %c0_9] : memref<1x128xf32, #tpu.memory_space<vmem>>, vector<1x128xf32>
    %12 = vector.broadcast %11 : vector<1x128xf32> to vector<16x128xf32>
    %13 = arith.addf %10, %12 : vector<16x128xf32>
    %14 = math.tanh %13 : vector<16x128xf32>
    %15 = arith.truncf %14 : vector<16x128xf32> to vector<16x128xbf16>
    %c0_10 = arith.constant 0 : index
    %c0_11 = arith.constant 0 : index
    %16 = vector.load %arg6[%c0_10, %c0_11] : memref<128x128xbf16, #tpu.memory_space<vmem>>, vector<128x128xbf16>
    %cst_12 = arith.constant dense<0.000000e+00> : vector<16x128xf32>
    %17 = tpu.matmul %15, %16, %cst_12 {dimension_numbers = #tpu.dot_dimension_numbers<[1], [0], [0], [1], [0, 0, 1, 1], [], []>} : vector<16x128xbf16>, vector<128x128xbf16>, vector<16x128xf32> -> vector<16x128xf32>
    %c0_13 = arith.constant 0 : index
    %c0_14 = arith.constant 0 : index
    %18 = vector.load %arg7[%c0_13, %c0_14] : memref<1x128xf32, #tpu.memory_space<vmem>>, vector<1x128xf32>
    %19 = vector.broadcast %18 : vector<1x128xf32> to vector<16x128xf32>
    %20 = arith.addf %17, %19 : vector<16x128xf32>
    %c0_15 = arith.constant 0 : index
    %c0_16 = arith.constant 0 : index
    %21 = vector.load %arg9[%c0_15, %c0_16] : memref<16x128xf32, #tpu.memory_space<vmem>>, vector<16x128xf32>
    tpu.vector_store %arg9[%c0_15, %c0_16], %14 {strides = array<i32>} : memref<16x128xf32, #tpu.memory_space<vmem>>, vector<16x128xf32>,
    %c0_17 = arith.constant 0 : index
    %c0_18 = arith.constant 0 : index
    %22 = vector.load %arg8[%c0_17, %c0_18] : memref<16x128xf32, #tpu.memory_space<vmem>>, vector<16x128xf32>
    tpu.vector_store %arg8[%c0_17, %c0_18], %20 {strides = array<i32>} : memref<16x128xf32, #tpu.memory_space<vmem>>, vector<16x128xf32>,
    return
  }
  func.func @transform_0(%arg0: i32) -> (i32, i32) {
    %c0_i32 = arith.constant 0 : i32
    %c0_i32_0 = arith.constant 0 : i32
    return %arg0, %c0_i32 : i32, i32
  }
  func.func @transform_1(%arg0: i32) -> (i32, i32) {
    %c0_i32 = arith.constant 0 : i32
    %c0_i32_0 = arith.constant 0 : i32
    %c0_i32_1 = arith.constant 0 : i32
    return %c0_i32, %c0_i32_0 : i32, i32
  }
  func.func @transform_2(%arg0: i32) -> (i32, i32) {
    %c0_i32 = arith.constant 0 : i32
    %c0_i32_0 = arith.constant 0 : i32
    %c0_i32_1 = arith.constant 0 : i32
    return %c0_i32, %c0_i32_0 : i32, i32
  }
  func.func @transform_3(%arg0: i32) -> (i32, i32) {
    %c0_i32 = arith.constant 0 : i32
    %c0_i32_0 = arith.constant 0 : i32
    %c0_i32_1 = arith.constant 0 : i32
    return %c0_i32, %c0_i32_0 : i32, i32
  }
  func.func @transform_4(%arg0: i32) -> (i32, i32) {
    %c0_i32 = arith.constant 0 : i32
    %c0_i32_0 = arith.constant 0 : i32
    %c0_i32_1 = arith.constant 0 : i32
    return %c0_i32, %c0_i32_0 : i32, i32
  }
  func.func @transform_5(%arg0: i32) -> (i32, i32) {
    %c0_i32 = arith.constant 0 : i32
    %c0_i32_0 = arith.constant 0 : i32
    %c0_i32_1 = arith.constant 0 : i32
    return %c0_i32, %c0_i32_0 : i32, i32
  }
  func.func @transform_6(%arg0: i32) -> (i32, i32) {
    %c0_i32 = arith.constant 0 : i32
    %c0_i32_0 = arith.constant 0 : i32
    %c0_i32_1 = arith.constant 0 : i32
    return %c0_i32, %c0_i32_0 : i32, i32
  }
  func.func @transform_7(%arg0: i32) -> (i32, i32) {
    %c0_i32 = arith.constant 0 : i32
    %c0_i32_0 = arith.constant 0 : i32
    return %arg0, %c0_i32 : i32, i32
  }
  func.func @transform_8(%arg0: i32) -> (i32, i32) {
    %c0_i32 = arith.constant 0 : i32
    %c0_i32_0 = arith.constant 0 : i32
    return %arg0, %c0_i32 : i32, i32
  }
}

</mosaic_0001>

<bundles_post_ra>
// kernel: roberta_classification_head.1
= control target key start
LH: loop header
LB: loop body
LE: loop exit
PB: predicated region body
PF: predicated region fallthrough
CT: control target
= control target key end

     0   :  { %14 = vsyncpa [#allocation3], 0  ;;  %s686_s0 = inlined_call_operand.vmem [shape: f32[16,128], index: 0, kind: input, shape index: {}]   ;;  %s687_s1 = inlined_call_operand.hbm [shape: bf16[128,128], index: 1, kind: input, shape index: {}]   ;;  %s688_s2 = inlined_call_operand.vmem [shape: f32[1,128], index: 2, kind: input, shape index: {}]   ;;  %s689_s3 = inlined_call_operand.hbm [shape: bf16[128,128], index: 3, kind: input, shape index: {}]   ;;  %s690_s4 = inlined_call_operand.vmem [shape: f32[1,128], index: 4, kind: input, shape index: {}]   ;;  %s691_s5 = inlined_call_operand.hbm [shape: bf16[128,128], index: 5, kind: input, shape index: {}]   ;;  %s692_s6 = inlined_call_operand.vmem [shape: f32[1,128], index: 6, kind: input, shape index: {}]   ;;  %s693_s7 = inlined_call_operand.vmem [shape: f32[16,128], index: 7, kind: output, shape index: {0}]   ;;  %s694_s8 = inlined_call_operand.hbm [shape: f32[16,128], index: 8, kind: output, shape index: {1}]  }
   0x1   :  { %15 = vsyncpa [#allocation6], 0 }
   0x2   :  { %16 = vsyncpa [#allocation4], 0  ;;  %s38_s29 = sshll.u32 %s689_s3, 4  ;;  %s600_s30 = smov [#allocation5]   ;;  %s39_s29 = int_to_ptr.hbm [resolvable:$true] %s38_s29 }
   0x3   :  { %s40_s9 = sshll.u32 %s600_s30, 4  ;;  %s23_s12 = sshll.u32 %s687_s1, 4  ;;  %s41_s9 = int_to_ptr.vmem [resolvable:$true] %s40_s9  ;;  %s24_s12 = int_to_ptr.hbm [resolvable:$true] %s23_s12 }
   0x4   :  { %s601_s13 = smov 64   ;;  %s602_s14 = smov 4  }
   0x5   :  { %46 = dma.hbm_to_vmem [thread:$0]  %s39_s29, 1024, %s41_s9, [#allocation6], %s601_s13, %s601_s13, %s602_s14  }
   0x6   :  { %s603_s15 = smov [#allocation2]   ;;  %s53_s19 = sshll.u32 %s691_s5, 4  ;;  %s54_s19 = int_to_ptr.hbm [resolvable:$true] %s53_s19 }
   0x7   :  { %s25_s16 = sshll.u32 %s603_s15, 4  ;;  %s604_s3 = smov [#allocation7]   ;;  %s26_s16 = int_to_ptr.vmem [resolvable:$true] %s25_s16 }
   0x8   :  { %31 = dma.hbm_to_vmem [thread:$0]  %s24_s12, 1024, %s26_s16, [#allocation3], %s601_s13, %s601_s13, %s602_s14  }
   0x9   :  { %s55_s20 = sshll.u32 %s604_s3, 4  ;;  %s56_s20 = int_to_ptr.vmem [resolvable:$true] %s55_s20 }
   0xa   :  { %61 = dma.hbm_to_vmem [thread:$0]  %s54_s19, 1024, %s56_s20, [#allocation6], %s601_s13, %s601_s13, %s602_s14  }
   0xb   :  { %594 = dma.done.wait [#allocation3], 1024  }
   0xc   :  { %595 = vsyncadd [#allocation3], 4294966272 }
   0xd   :  { %596 = dma.done.wait [#allocation6], 2048  }
   0xe   :  { %597 = vsyncadd [#allocation6], 4294965248  ;;  %v462_v0 = vld [vmem:[#allocation2 + $0x38] sm:$0xff]  ;;  %v461_v1 = vld [vmem:[#allocation2 + $0x30] sm:$0xff]  ;;  %s605_s25 = smov [#allocation8]   ;;  %s343_s29 = sshll.u32 %s694_s8, 4  ;;  %s344_s29 = int_to_ptr.hbm [resolvable:$true] %s343_s29 }
   0xf   :  { %147 = vmatpush.bf16.msra.mxu0 %v462_v0  ;;  %v470_v2 = vld [vmem:[#allocation5 + $0x38] sm:$0xff]  ;;  %v469_v3 = vld [vmem:[#allocation5 + $0x30] sm:$0xff]  ;;  %v460_v4 = vld [vmem:[#allocation2 + $0x28] sm:$0xff]  ;;  %s341_s26 = sshll.u32 %s605_s25, 4  ;;  %s607_s30 = smov 8   ;;  %s342_s26 = int_to_ptr.vmem [resolvable:$true] %s341_s26 }
  0x10   :  { %232 = vmatpush.bf16.msra.mxu1 %v470_v2  ;;  %v468_v5 = vld [vmem:[#allocation5 + $0x28] sm:$0xff]  ;;  %v459_v6 = vld [vmem:[#allocation2 + $0x20] sm:$0xff]  ;;  %v458_v7 = vld [vmem:[#allocation2 + $0x18] sm:$0xff] }
  0x11   :  { %v457_v8 = vld [vmem:[#allocation2 + $0x10] sm:$0xff]  ;;  %v456_v9 = vld [vmem:[#allocation2 + $0x8] sm:$0xff]  ;;  %v455_v10 = vld [vmem:[#allocation2] sm:$0xff] }
  0x12   :  { %v76_v11 = vld [vmem:[%s686_s0] sm:$0xff]  ;;  %v77_v12 = vld [vmem:[%s686_s0 + $0x8] sm:$0xff]  ;;  %v466_v15 = vld [vmem:[#allocation5 + $0x18] sm:$0xff] }
  0x13   :  { %148 = vmatpush.bf16.msra.mxu0 %v461_v1  ;;  %v78_v13 = vpack.c.bf16 %v77_v12, %v76_v11  ;;  %v467_v14 = vld [vmem:[#allocation5 + $0x20] sm:$0xff]  ;;  %v465_v16 = vld [vmem:[#allocation5 + $0x10] sm:$0xff]  ;;  %v464_v17 = vld [vmem:[#allocation5 + $0x8] sm:$0xff] }
  0x14   :  { %233 = vmatpush.bf16.msra.mxu1 %v469_v3  ;;  %v463_v18 = vld [vmem:[#allocation5] sm:$0xff]  ;;  %v478_v19 = vld [vmem:[#allocation7 + $0x38] sm:$0xff]  ;;  %v477_v20 = vld [vmem:[#allocation7 + $0x30] sm:$0xff] }
  0x15   :  { %317 = vmatpush.bf16.msra.mxu2 %v478_v19  ;;  %v476_v21 = vld [vmem:[#allocation7 + $0x28] sm:$0xff]  ;;  %v487_v23 = vld [vmem:[%s688_s2] ss:$0 sm:$0xff]  ;;  %v474_v31 = vld [vmem:[#allocation7 + $0x18] sm:$0xff] }
  0x16   :  { %v475_v30 = vld [vmem:[#allocation7 + $0x20] sm:$0xff]  ;;  %v473_v32 = vld [vmem:[#allocation7 + $0x10] sm:$0xff]  ;;  %v472_v33 = vld [vmem:[#allocation7 + $0x8] sm:$0xff] }
  0x17   :  { %149 = vmatpush.bf16.msra.mxu0 %v460_v4  ;;  %v471_v34 = vld [vmem:[#allocation7] sm:$0xff] }
  0x18   :  { %234 = vmatpush.bf16.msra.mxu1 %v468_v5  ;;  %v488_v35 = vld [vmem:[%s690_s4] ss:$0 sm:$0xff]  ;;  %s606_s4 = smov 128  }
  0x19   :  { %318 = vmatpush.bf16.msra.mxu2 %v477_v20  ;;  %v489_v43 = vld [vmem:[%s692_s6] ss:$0 sm:$0xff] }
  0x1b   :  { %150 = vmatpush.bf16.msra.mxu0 %v459_v6 }
  0x1c   :  { %235 = vmatpush.bf16.msra.mxu1 %v467_v14 }
  0x1d   :  { %319 = vmatpush.bf16.msra.mxu2 %v476_v21 }
  0x1f   :  { %151 = vmatpush.bf16.msra.mxu0 %v458_v7 }
  0x20   :  { %236 = vmatpush.bf16.msra.mxu1 %v466_v15 }
  0x21   :  { %320 = vmatpush.bf16.msra.mxu2 %v475_v30 }
  0x23   :  { %152 = vmatpush.bf16.msra.mxu0 %v457_v8 }
  0x24   :  { %237 = vmatpush.bf16.msra.mxu1 %v465_v16 }
  0x25   :  { %321 = vmatpush.bf16.msra.mxu2 %v474_v31 }
  0x27   :  { %153 = vmatpush.bf16.msra.mxu0 %v456_v9 }
  0x28   :  { %238 = vmatpush.bf16.msra.mxu1 %v464_v17 }
  0x29   :  { %322 = vmatpush.bf16.msra.mxu2 %v473_v32 }
  0x2b   :  { %154 = vmatpush.bf16.msra.mxu0 %v455_v10 }
  0x2c   :  { %239 = vmatpush.bf16.msra.mxu1 %v463_v18 }
  0x2d   :  { %323 = vmatpush.bf16.msra.mxu2 %v472_v33 }
  0x2e   :  { %155 = vmatmul.bf16.vlgmr.msra.gmra.mxu0 %v78_v13 }
  0x31   :  { %324 = vmatpush.bf16.msra.mxu2 %v471_v34 }
  0xab   :  { %v156_v22 = vpop.f32.mrf.mxu0 }
  0xac   :  { %v157_v24 = vadd.f32 %v487_v23, %v156_v22 }
  0xae   :  { %490 = vtanh.f32 %v157_v24 }
  0xb3   :  { %v158_v25 = vpop.f32.mrf.mxu0 }
  0xb4   :  { %v159_v26 = vadd.f32 %v487_v23, %v158_v25  ;;  %v491_v27 = vpop.eup %490 }
  0xb6   :  { %492 = vtanh.f32 %v159_v26 }
  0xbc   :  { %v493_v28 = vpop.eup %492 }
  0xbd   :  { %v163_v29 = vpack.c.bf16 %v493_v28, %v491_v27 }
  0xbf   :  { %240 = vmatmul.bf16.vlgmr.msra.gmra.mxu1 %v163_v29 }
 0x13c   :  { %v241_v36 = vpop.f32.mrf.mxu1 }
 0x13d   :  { %v242_v37 = vadd.f32 %v488_v35, %v241_v36 }
 0x13f   :  { %494 = vtanh.f32 %v242_v37 }
 0x144   :  { %v243_v38 = vpop.f32.mrf.mxu1 }
 0x145   :  { %v495_v39 = vpop.eup %494  ;;  %v244_v40 = vadd.f32 %v488_v35, %v243_v38 }
 0x146   :  { %331 = vst [vmem:[#allocation8] sm:$0xff] %v495_v39 }
 0x147   :  { %496 = vtanh.f32 %v244_v40 }
 0x14d   :  { %v497_v41 = vpop.eup %496 }
 0x14e   :  { %332 = vst [vmem:[#allocation8 + $0x8] sm:$0xff] %v497_v41  ;;  %v248_v42 = vpack.c.bf16 %v497_v41, %v495_v39 }
 0x14f   :  { %349 = dma.vmem_to_hbm [thread:$0]  %s342_s26, 256, %s344_s29, [#allocation4], %s606_s4, %s606_s4, %s607_s30  }
 0x150   :  { %325 = vmatmul.bf16.vlgmr.msra.gmra.mxu2 %v248_v42 }
 0x1d3   :  { %v326_v44 = vpop.f32.mrf.mxu2 }
 0x1d4   :  { %v327_v45 = vadd.f32 %v489_v43, %v326_v44 }
 0x1d6   :  { %333 = vst [vmem:[%s693_s7] sm:$0xff] %v327_v45 }
 0x1db   :  { %v328_v46 = vpop.f32.mrf.mxu2 }
 0x1dc   :  { %v329_v47 = vadd.f32 %v489_v43, %v328_v46 }
 0x1de   :  { %334 = vst [vmem:[%s693_s7 + $0x8] sm:$0xff] %v329_v47 }
 0x1df   :  { %598 = dma.done.wait [#allocation4], 256  }
 0x1e0   :  { %599 = vsyncadd [#allocation4], 4294967040 }
 0x1e1   :  { %356 = vsyncpa [#allocation3], 1 }
 0x1e2   :  { %357 = vsyncpa [#allocation6], 1 }
 0x1e3   :  { %358 = vsyncpa [#allocation4], 1 }

</bundles_post_ra>
